<compile_context>
chip_gen: v7x
topology: tpu7x:2x2x1
jax: 0.10.0
libtpu: 0.0.40
codegen_flags: <defaults>
</compile_context>

<pallas_src>
import jax
import jax.numpy as jnp
from jax.experimental import pallas as pl
from jax.experimental.pallas import tpu as pltpu

_EPS = 1e-5
_NEG_BIG = -1e30  # logit bias for padded (fake) classes -> exp() == 0 exactly


def _round_up(x, m):
    return ((x + m - 1) // m) * m


def resnet_tail_kernel(x_ref, a18_ref, b18_ref, w_ref, b19_ref, out_ref):
    """One batch tile.

    x_ref  : [TILE_N, C, HW]  f32/bf16, VMEM  (native NCHW layout, HW on lanes)
    a18/b18: [1, C]           f32, VMEM   (bn18 scale/shift with 1/fq_scale folded in)
    w_ref  : [C, K_pad]       bf16, VMEM  (fc weight with bn19 + fq dequant folded in)
    b19_ref: [1, K_pad]       f32, VMEM   (fc bias with bn19 folded in; pad cols = -1e30)
    out_ref: [TILE_N, K_pad]  f32, VMEM   (lane-dense log-probs)
    """
    # Global average pool over spatial (AdaptiveAvgPool2d((1,1)) + flatten).
    # Upcast first so bf16 activations still accumulate in f32.
    x = x_ref[...].astype(jnp.float32)                            # [TILE_N, C, HW]
    pooled = jnp.mean(x, axis=-1)                                 # [TILE_N, C]

    # bn18 (eval mode) with the fake-quant pre-scale (1/s) folded in.
    h = pooled * a18_ref[...] + b18_ref[...]

    # fq18: symmetric per-tensor int8 fake quantize.  The dequant scale s is
    # folded into the fc weight, so only round+clamp remains here; q is on the
    # integer grid and therefore exact in bf16.
    # TODO(synk): confirm the clamp range against the PyTorch observer config
    # (some symmetric int8 observers use [-127, 127] instead of [-128, 127]).
    q = jnp.clip(jnp.round(h), -128.0, 127.0)

    # fc + bn19 + fq dequant (all folded into W'/b'): bf16 MXU, f32 accumulation.
    logits = jnp.dot(q.astype(w_ref.dtype), w_ref[...],
                     preferred_element_type=jnp.float32) + b19_ref[...]

    # logsoftmax over classes (kept in f32; padded classes carry -1e30 bias).
    m = jnp.max(logits, axis=-1, keepdims=True)
    z = logits - m
    lse = jnp.log(jnp.sum(jnp.exp(z), axis=-1, keepdims=True))
    out_ref[...] = z - lse


def _fold_params(params, matmul_dtype):
    """One-time folding of the frozen BN / FQ / FC parameters."""
    f32 = jnp.float32
    s = params["fq_scale"].reshape(()).astype(f32)
    inv_s = 1.0 / s

    a18 = params["bn18_gamma"] * jax.lax.rsqrt(params["bn18_var"] + _EPS)
    b18 = params["bn18_beta"] - params["bn18_mean"] * a18
    a18 = (a18 * inv_s).astype(f32)                                # pre-scale by 1/s
    b18 = (b18 * inv_s).astype(f32)

    a19 = params["bn19_gamma"] * jax.lax.rsqrt(params["bn19_var"] + _EPS)
    w_fold = params["fc_w"].T * a19[None, :] * s                   # [C, K], dequant folded
    b_fold = (params["fc_b"] - params["bn19_mean"]) * a19 + params["bn19_beta"]
    return a18, b18, w_fold.astype(matmul_dtype), b_fold.astype(f32)


def _choose_tiling(N, row_bytes, block_budget_bytes):
    """Pick tile_n: multiple of 8, divisor of the 8-rounded batch, within the
    double-buffered VMEM budget, and giving >= 2 grid steps when possible."""
    N8 = _round_up(max(N, 1), 8)
    cap = block_budget_bytes // (2 * max(row_bytes, 1))            # 2x = double buffering
    cap = min(512, max(8, (cap // 8) * 8))
    if N8 >= 16:                                                   # >=2 steps: pipelining + both v7x TCs
        cap = min(cap, max(8, ((N8 // 2) // 8) * 8))
    best, t = 8, 8
    while t <= min(cap, N8):
        if N8 % t == 0:
            best = t
        t += 8
    return best, N8


def resnet_tail(x, params, *, matmul_dtype=jnp.bfloat16):
    """x: [N, C, H, W] float32 or bfloat16 (NCHW) -> [N, K] float32 log-probs."""
    N, C, H, W = x.shape
    HW = H * W
    K = params["fc_w"].shape[0]                                    # PyTorch weight: [K, C]

    a18, b18, w_fold, b_fold = _fold_params(params, matmul_dtype)

    # Lane-dense class axis: pad K up to a multiple of 128 (min 128).
    K_pad = max(128, _round_up(K, 128))
    w_pad = jnp.zeros((C, K_pad), matmul_dtype).at[:, :K].set(w_fold)
    b_pad = jnp.full((1, K_pad), _NEG_BIG, jnp.float32).at[0, :K].set(b_fold)
    a18 = a18.reshape(1, C)
    b18 = b18.reshape(1, C)

    # Keep the producer's layout and dtype: no transpose / upcast HBM pass.
    # The trailing reshape (H, W) -> HW is a free view.
    x3 = x.reshape(N, C, HW)
    x_itemsize = jnp.dtype(x3.dtype).itemsize

    # Generation-aware VMEM sizing.
    vmem_cap = 64 << 20
    try:
        vmem_cap = int(pltpu.get_tpu_info().vmem_capacity_bytes)
    except Exception:
        pass
    vmem_limit = int(min(int(vmem_cap * 3) // 4, 100 << 20))       # ~48 MiB v7x, ~96 MiB v5e/v6e

    param_bytes = (C * K_pad * jnp.dtype(matmul_dtype).itemsize + 2 * C * 4 + K_pad * 4)
    block_budget = max(1 << 20, vmem_limit - 2 * param_bytes - (4 << 20))
    row_bytes = HW * C * x_itemsize + K_pad * 4                    # x row + out row
    tile_n, N_pad = _choose_tiling(N, row_bytes, block_budget)

    if N_pad != N:
        # Only ever pads up to the next multiple of 8 (tile_n divides N_pad).
        x3 = jnp.pad(x3, ((0, N_pad - N), (0, 0), (0, 0)))
    grid = (N_pad // tile_n,)

    out = pl.pallas_call(
        resnet_tail_kernel,
        out_shape=jax.ShapeDtypeStruct((N_pad, K_pad), jnp.float32),
        grid=grid,
        in_specs=[
            pl.BlockSpec((tile_n, C, HW), lambda i: (i, 0, 0)),    # x, tiled over batch
            pl.BlockSpec((1, C), lambda i: (0, 0)),                # a18 (VMEM-resident)
            pl.BlockSpec((1, C), lambda i: (0, 0)),                # b18 (VMEM-resident)
            pl.BlockSpec((C, K_pad), lambda i: (0, 0)),            # folded fc weight
            pl.BlockSpec((1, K_pad), lambda i: (0, 0)),            # folded fc bias
        ],
        out_specs=pl.BlockSpec((tile_n, K_pad), lambda i: (i, 0)),
        compiler_params=pltpu.CompilerParams(
            dimension_semantics=("parallel",),                     # batch tiles split across TCs
            vmem_limit_bytes=vmem_limit,
        ),
    )(x3, a18, b18, w_pad, b_pad)

    return out[:N, :K]


def resnet_tail_reference(x, params):
    """Pure-JAX float32 reference of the PyTorch forward (for validation)."""
    N, C, H, W = x.shape
    xf = x.astype(jnp.float32)
    pooled = jnp.mean(xf.reshape(N, C, H * W), axis=-1)
    inv18 = jax.lax.rsqrt(params["bn18_var"] + _EPS)
    h = (pooled - params["bn18_mean"]) * inv18 * params["bn18_gamma"] + params["bn18_beta"]
    s = params["fq_scale"].reshape(())
    h = jnp.clip(jnp.round(h / s), -128.0, 127.0) * s
    logits = h @ params["fc_w"].T + params["fc_b"]
    inv19 = jax.lax.rsqrt(params["bn19_var"] + _EPS)
    logits = (logits - params["bn19_mean"]) * inv19 * params["bn19_gamma"] + params["bn19_beta"]
    return jax.nn.log_softmax(logits, axis=-1)


def make_params(key, C, K):
    ks = jax.random.split(key, 10)
    f32 = jnp.float32
    return {
        "bn18_mean":  jax.random.normal(ks[0], (C,), f32) * 0.1,
        "bn18_var":   jax.random.uniform(ks[1], (C,), f32, 0.5, 1.5),
        "bn18_gamma": jax.random.normal(ks[2], (C,), f32) * 0.1 + 1.0,
        "bn18_beta":  jax.random.normal(ks[3], (C,), f32) * 0.1,
        "fq_scale":   jnp.asarray([0.05], f32),
        "fc_w":       jax.random.normal(ks[4], (K, C), f32) * (1.0 / jnp.sqrt(C)),
        "fc_b":       jax.random.normal(ks[5], (K,), f32) * 0.05,
        "bn19_mean":  jax.random.normal(ks[6], (K,), f32) * 0.1,
        "bn19_var":   jax.random.uniform(ks[7], (K,), f32, 0.5, 1.5),
        "bn19_gamma": jax.random.normal(ks[8], (K,), f32) * 0.1 + 1.0,
        "bn19_beta":  jax.random.normal(ks[9], (K,), f32) * 0.1,
    }


if __name__ == "__main__":
    key = jax.random.PRNGKey(0)
    k_x, k_p = jax.random.split(key)

    # Small shapes consistent with the module's forward:
    # NCHW feature map -> global avgpool -> 1D features -> classes.
    N, C, H, W, K = 2, 32, 4, 4, 16
    x = jax.random.normal(k_x, (N, C, H, W), jnp.float32)
    params = make_params(k_p, C, K)

    # f32 activation path (matches the PyTorch float reference).
    out = jax.block_until_ready(resnet_tail(x, params))
    assert out.shape == (N, K) and out.dtype == jnp.float32
    # log-softmax rows must sum to ~1 in probability space.
    assert bool(jnp.all(jnp.abs(jnp.sum(jnp.exp(out), axis=-1) - 1.0) < 1e-4))
    ref = resnet_tail_reference(x, params)
    assert bool(jnp.all(jnp.abs(out - ref) < 5e-2)), float(jnp.max(jnp.abs(out - ref)))

    # bf16 activation streaming path (half the HBM read on the dominant tensor).
    out_bf = jax.block_until_ready(resnet_tail(x.astype(jnp.bfloat16), params))
    assert out_bf.shape == (N, K) and out_bf.dtype == jnp.float32
    assert bool(jnp.all(jnp.abs(jnp.sum(jnp.exp(out_bf), axis=-1) - 1.0) < 1e-4))
    assert bool(jnp.all(jnp.abs(out_bf - ref) < 2.5e-1)), float(jnp.max(jnp.abs(out_bf - ref)))

    print("KERNEL_OK")
</pallas_src>

<mosaic_0001>
module attributes {stable_mosaic.version = 11 : i64} {
  func.func @resnet_tail_kernel(%arg0: i32, %arg1: memref<8x32x16xf32, #tpu.memory_space<vmem>>, %arg2: memref<1x32xf32, #tpu.memory_space<vmem>>, %arg3: memref<1x32xf32, #tpu.memory_space<vmem>>, %arg4: memref<32x128xbf16, #tpu.memory_space<vmem>>, %arg5: memref<1x128xf32, #tpu.memory_space<vmem>>, %arg6: memref<8x128xf32, #tpu.memory_space<vmem>>) attributes {dimension_semantics = [#tpu.dimension_semantics<parallel>], iteration_bounds = array<i64: 1>, scalar_prefetch = 0 : i64, scratch_operands = 0 : i64, tpu.core_type = #tpu.core_type<tc>, window_params = [{transform_indices = @transform_0, window_bounds = array<i64: 8, 32, 16>}, {pipeline_mode = #tpu.pipeline_mode<synchronous>, transform_indices = @transform_1, window_bounds = array<i64: 1, 32>}, {pipeline_mode = #tpu.pipeline_mode<synchronous>, transform_indices = @transform_2, window_bounds = array<i64: 1, 32>}, {pipeline_mode = #tpu.pipeline_mode<synchronous>, transform_indices = @transform_3, window_bounds = array<i64: 32, 128>}, {pipeline_mode = #tpu.pipeline_mode<synchronous>, transform_indices = @transform_4, window_bounds = array<i64: 1, 128>}, {transform_indices = @transform_5, window_bounds = array<i64: 8, 128>}]} {
    %c0 = arith.constant 0 : index
    %c0_0 = arith.constant 0 : index
    %c0_1 = arith.constant 0 : index
    %0 = vector.load %arg1[%c0, %c0_0, %c0_1] : memref<8x32x16xf32, #tpu.memory_space<vmem>>, vector<8x32x16xf32>
    %cst = arith.constant dense<0.000000e+00> : vector<8x32xf32>
    %1 = vector.multi_reduction <add>, %0, %cst [2] : vector<8x32x16xf32> to vector<8x32xf32>
    %cst_2 = arith.constant 1.600000e+01 : f32
    %2 = vector.broadcast %cst_2 : f32 to vector<8x32xf32>
    %3 = arith.divf %1, %2 : vector<8x32xf32>
    %c0_3 = arith.constant 0 : index
    %c0_4 = arith.constant 0 : index
    %4 = vector.load %arg2[%c0_3, %c0_4] : memref<1x32xf32, #tpu.memory_space<vmem>>, vector<1x32xf32>
    %5 = vector.broadcast %4 : vector<1x32xf32> to vector<8x32xf32>
    %6 = arith.mulf %3, %5 : vector<8x32xf32>
    %c0_5 = arith.constant 0 : index
    %c0_6 = arith.constant 0 : index
    %7 = vector.load %arg3[%c0_5, %c0_6] : memref<1x32xf32, #tpu.memory_space<vmem>>, vector<1x32xf32>
    %8 = vector.broadcast %7 : vector<1x32xf32> to vector<8x32xf32>
    %9 = arith.addf %6, %8 : vector<8x32xf32>
    %10 = math.roundeven %9 : vector<8x32xf32>
    %cst_7 = arith.constant -1.280000e+02 : f32
    %cst_8 = arith.constant 1.270000e+02 : f32
    %11 = vector.broadcast %cst_7 : f32 to vector<8x32xf32>
    %12 = arith.maximumf %11, %10 : vector<8x32xf32>
    %13 = vector.broadcast %cst_8 : f32 to vector<8x32xf32>
    %14 = arith.minimumf %13, %12 : vector<8x32xf32>
    %15 = arith.truncf %14 : vector<8x32xf32> to vector<8x32xbf16>
    %c0_9 = arith.constant 0 : index
    %c0_10 = arith.constant 0 : index
    %16 = vector.load %arg4[%c0_9, %c0_10] : memref<32x128xbf16, #tpu.memory_space<vmem>>, vector<32x128xbf16>
    %cst_11 = arith.constant dense<0.000000e+00> : vector<8x128xf32>
    %17 = tpu.matmul %15, %16, %cst_11 {dimension_numbers = #tpu.dot_dimension_numbers<[1], [0], [0], [1], [0, 0, 1, 1], [], []>} : vector<8x32xbf16>, vector<32x128xbf16>, vector<8x128xf32> -> vector<8x128xf32>
    %c0_12 = arith.constant 0 : index
    %c0_13 = arith.constant 0 : index
    %18 = vector.load %arg5[%c0_12, %c0_13] : memref<1x128xf32, #tpu.memory_space<vmem>>, vector<1x128xf32>
    %19 = vector.broadcast %18 : vector<1x128xf32> to vector<8x128xf32>
    %20 = arith.addf %17, %19 : vector<8x128xf32>
    %cst_14 = arith.constant dense<0xFF800000> : vector<8xf32>
    %21 = vector.multi_reduction <maximumf>, %20, %cst_14 [1] : vector<8x128xf32> to vector<8xf32>
    %22 = vector.shape_cast %21 : vector<8xf32> to vector<8x1xf32>
    %23 = vector.broadcast %22 : vector<8x1xf32> to vector<8x128xf32>
    %24 = arith.subf %20, %23 : vector<8x128xf32>
    %25 = math.exp %24 : vector<8x128xf32>
    %cst_15 = arith.constant dense<0.000000e+00> : vector<8xf32>
    %26 = vector.multi_reduction <add>, %25, %cst_15 [1] : vector<8x128xf32> to vector<8xf32>
    %27 = vector.shape_cast %26 : vector<8xf32> to vector<8x1xf32>
    %28 = math.log %27 : vector<8x1xf32>
    %29 = vector.broadcast %28 : vector<8x1xf32> to vector<8x128xf32>
    %30 = arith.subf %24, %29 : vector<8x128xf32>
    %c0_16 = arith.constant 0 : index
    %c0_17 = arith.constant 0 : index
    %31 = vector.load %arg6[%c0_16, %c0_17] : memref<8x128xf32, #tpu.memory_space<vmem>>, vector<8x128xf32>
    tpu.vector_store %arg6[%c0_16, %c0_17], %30 {strides = array<i32>} : memref<8x128xf32, #tpu.memory_space<vmem>>, vector<8x128xf32>,
    return
  }
  func.func @transform_0(%arg0: i32) -> (i32, i32, i32) {
    %c0_i32 = arith.constant 0 : i32
    %c0_i32_0 = arith.constant 0 : i32
    %c0_i32_1 = arith.constant 0 : i32
    return %arg0, %c0_i32, %c0_i32_0 : i32, i32, i32
  }
  func.func @transform_1(%arg0: i32) -> (i32, i32) {
    %c0_i32 = arith.constant 0 : i32
    %c0_i32_0 = arith.constant 0 : i32
    %c0_i32_1 = arith.constant 0 : i32
    return %c0_i32, %c0_i32_0 : i32, i32
  }
  func.func @transform_2(%arg0: i32) -> (i32, i32) {
    %c0_i32 = arith.constant 0 : i32
    %c0_i32_0 = arith.constant 0 : i32
    %c0_i32_1 = arith.constant 0 : i32
    return %c0_i32, %c0_i32_0 : i32, i32
  }
  func.func @transform_3(%arg0: i32) -> (i32, i32) {
    %c0_i32 = arith.constant 0 : i32
    %c0_i32_0 = arith.constant 0 : i32
    %c0_i32_1 = arith.constant 0 : i32
    return %c0_i32, %c0_i32_0 : i32, i32
  }
  func.func @transform_4(%arg0: i32) -> (i32, i32) {
    %c0_i32 = arith.constant 0 : i32
    %c0_i32_0 = arith.constant 0 : i32
    %c0_i32_1 = arith.constant 0 : i32
    return %c0_i32, %c0_i32_0 : i32, i32
  }
  func.func @transform_5(%arg0: i32) -> (i32, i32) {
    %c0_i32 = arith.constant 0 : i32
    %c0_i32_0 = arith.constant 0 : i32
    return %arg0, %c0_i32 : i32, i32
  }
}

</mosaic_0001>

<bundles_post_ra>
// kernel: tpu_custom_call.1
= control target key start
LH: loop header
LB: loop body
LE: loop exit
PB: predicated region body
PF: predicated region fallthrough
CT: control target
= control target key end

     0   :  { %vm54_vm0 = vcmask 130048   ;;  %s1362_s0 = inlined_call_operand.vmem [shape: f32[8,32,16], index: 0, kind: input, shape index: {}]   ;;  %s1363_s1 = inlined_call_operand.vmem [shape: f32[1,32], index: 1, kind: input, shape index: {}]   ;;  %s1364_s2 = inlined_call_operand.vmem [shape: f32[1,32], index: 2, kind: input, shape index: {}]   ;;  %s1365_s3 = inlined_call_operand.vmem [shape: bf16[32,128], index: 3, kind: input, shape index: {}]   ;;  %s1366_s4 = inlined_call_operand.vmem [shape: f32[1,128], index: 4, kind: input, shape index: {}]   ;;  %s1367_s5 = inlined_call_operand.hbm [shape: f32[8,128], index: 5, kind: output, shape index: {}]  }
   0x1   :  { %v26_v0 = vld [vmem:[%s1362_s0 + $0x20] sm:$0xff]  ;;  %v27_v2 = vld [vmem:[%s1362_s0 + $0x28] sm:$0xff]  ;;  %v25_v8 = vld [vmem:[%s1362_s0 + $0x18] sm:$0xff] }
   0x2   :  { %v22_v1 = vld [vmem:[%s1362_s0] sm:$0xff]  ;;  %v67_v3 = vsel %vm54_vm0, %v26_v0, 0.0  ;;  %v23_v5 = vld [vmem:[%s1362_s0 + $0x8] sm:$0xff]  ;;  %v70_v6 = vsel %vm54_vm0, %v27_v2, 0.0  ;;  %v24_v9 = vld [vmem:[%s1362_s0 + $0x10] sm:$0xff]  ;;  %v64_v10 = vsel %vm54_vm0, %v25_v8, 0.0 }
   0x3   :  { %v55_v4 = vsel %vm54_vm0, %v22_v1, 0.0  ;;  %68 = vadd.xlane.f32.xlu1 %v67_v3  ;;  %v58_v7 = vsel %vm54_vm0, %v23_v5, 0.0  ;;  %v61_v11 = vsel %vm54_vm0, %v24_v9, 0.0  ;;  %v29_v12 = vld [vmem:[%s1362_s0 + $0x38] sm:$0xff]  ;;  %v28_v13 = vld [vmem:[%s1362_s0 + $0x30] sm:$0xff]  ;;  %v31_v16 = vld [vmem:[%s1362_s0 + $0x48] sm:$0xff] }
   0x4   :  { %56 = vadd.xlane.f32.xlu0 %v55_v4  ;;  %v76_v14 = vsel %vm54_vm0, %v29_v12, 0.0  ;;  %v73_v15 = vsel %vm54_vm0, %v28_v13, 0.0  ;;  %v30_v17 = vld [vmem:[%s1362_s0 + $0x40] sm:$0xff] }
   0x7   :  { %71 = vadd.xlane.f32.xlu1 %v70_v6 }
   0x8   :  { %59 = vadd.xlane.f32.xlu0 %v58_v7 }
   0xb   :  { %65 = vadd.xlane.f32.xlu1 %v64_v10 }
   0xc   :  { %62 = vadd.xlane.f32.xlu0 %v61_v11 }
   0xd   :  { %10 = vsyncpa [#allocation3], 0  ;;  %v82_v18 = vsel %vm54_vm0, %v31_v16, 0.0  ;;  %v79_v19 = vsel %vm54_vm0, %v30_v17, 0.0  ;;  %v33_v20 = vld [vmem:[%s1362_s0 + $0x58] sm:$0xff]  ;;  %v32_v21 = vld [vmem:[%s1362_s0 + $0x50] sm:$0xff] }
   0xe   :  { %v88_v22 = vsel %vm54_vm0, %v33_v20, 0.0  ;;  %v85_v23 = vsel %vm54_vm0, %v32_v21, 0.0  ;;  %v35_v24 = vld [vmem:[%s1362_s0 + $0x68] sm:$0xff]  ;;  %v34_v25 = vld [vmem:[%s1362_s0 + $0x60] sm:$0xff]  ;;  %v37_v28 = vld [vmem:[%s1362_s0 + $0x78] sm:$0xff]  ;;  %v906_v2 = vmov 0  }
   0xf   :  { %77 = vadd.xlane.f32.xlu1 %v76_v14  ;;  %v94_v26 = vsel %vm54_vm0, %v35_v24, 0.0  ;;  %v91_v27 = vsel %vm54_vm0, %v34_v25, 0.0  ;;  %v36_v29 = vld [vmem:[%s1362_s0 + $0x70] sm:$0xff]  ;;  %v100_v30 = vsel %vm54_vm0, %v37_v28, 0.0  ;;  %v39_v32 = vld [vmem:[%s1362_s0 + $0x88] sm:$0xff]  ;;  %v38_v33 = vld [vmem:[%s1362_s0 + $0x80] sm:$0xff]  ;;  %874 = vset.pattern.permute.xlu0 %v906_v2 }
  0x10   :  { %74 = vadd.xlane.f32.xlu0 %v73_v15  ;;  %v97_v31 = vsel %vm54_vm0, %v36_v29, 0.0  ;;  %v106_v34 = vsel %vm54_vm0, %v39_v32, 0.0  ;;  %v103_v35 = vsel %vm54_vm0, %v38_v33, 0.0  ;;  %v41_v36 = vld [vmem:[%s1362_s0 + $0x98] sm:$0xff]  ;;  %v40_v37 = vld [vmem:[%s1362_s0 + $0x90] sm:$0xff]  ;;  %v43_v40 = vld [vmem:[%s1362_s0 + $0xa8] sm:$0xff]  ;;  %875 = vset.pattern.permute.xlu1 %v906_v2 }
  0x11   :  { %v112_v38 = vsel %vm54_vm0, %v41_v36, 0.0  ;;  %v109_v39 = vsel %vm54_vm0, %v40_v37, 0.0  ;;  %v42_v41 = vld [vmem:[%s1362_s0 + $0xa0] sm:$0xff]  ;;  %v118_v42 = vsel %vm54_vm0, %v43_v40, 0.0  ;;  %v45_v44 = vld [vmem:[%s1362_s0 + $0xb8] sm:$0xff]  ;;  %v44_v45 = vld [vmem:[%s1362_s0 + $0xb0] sm:$0xff] }
  0x12   :  { %v115_v43 = vsel %vm54_vm0, %v42_v41, 0.0  ;;  %v124_v46 = vsel %vm54_vm0, %v45_v44, 0.0  ;;  %v121_v47 = vsel %vm54_vm0, %v44_v45, 0.0  ;;  %v47_v48 = vld [vmem:[%s1362_s0 + $0xc8] sm:$0xff]  ;;  %v46_v49 = vld [vmem:[%s1362_s0 + $0xc0] sm:$0xff]  ;;  %v49_v52 = vld [vmem:[%s1362_s0 + $0xd8] sm:$0xff] }
  0x13   :  { %83 = vadd.xlane.f32.xlu1 %v82_v18  ;;  %v130_v50 = vsel %vm54_vm0, %v47_v48, 0.0  ;;  %v127_v51 = vsel %vm54_vm0, %v46_v49, 0.0  ;;  %v48_v53 = vld [vmem:[%s1362_s0 + $0xd0] sm:$0xff]  ;;  %v136_v54 = vsel %vm54_vm0, %v49_v52, 0.0  ;;  %v51_v56 = vld [vmem:[%s1362_s0 + $0xe8] sm:$0xff]  ;;  %v50_v57 = vld [vmem:[%s1362_s0 + $0xe0] sm:$0xff] }
  0x14   :  { %80 = vadd.xlane.f32.xlu0 %v79_v19  ;;  %v133_v55 = vsel %vm54_vm0, %v48_v53, 0.0  ;;  %v142_v58 = vsel %vm54_vm0, %v51_v56, 0.0  ;;  %v139_v59 = vsel %vm54_vm0, %v50_v57, 0.0  ;;  %v53_v60 = vld [vmem:[%s1362_s0 + $0xf8] sm:$0xff]  ;;  %v52_v61 = vld [vmem:[%s1362_s0 + $0xf0] sm:$0xff]  ;;  %vm908_vm1 = vmmov 0  }
  0x15   :  { %v148_v62 = vsel %vm54_vm0, %v53_v60, 0.0  ;;  %v145_v63 = vsel %vm54_vm0, %v52_v61, 0.0  ;;  %v821_v0 = vld [vmem:[%s1363_s1] ss:$0 sm:$0xff]  ;;  %vm576_vm2 = vcmask 130112   ;;  %vm583_vm3 = vcmask 195712  }
  0x16   :  { %v822_v1 = vld [vmem:[%s1364_s2] ss:$0 sm:$0xff]  ;;  %vm590_vm4 = vcmask 261312   ;;  %vm725_vm5 = vcmask 1041409   ;;  %vm727_vm6 = vcmask 1042434   ;;  %vm729_vm7 = vcmask 1043459  }
  0x17   :  { %89 = vadd.xlane.f32.xlu1 %v88_v22  ;;  %vm731_vm8 = vcmask 1044484   ;;  %vm733_vm9 = vcmask 1045509   ;;  %vm735_vm10 = vcmask 1046534   ;;  %vm737_vm11 = vcmask 1047559   ;;  %s909_s13 = smov [#allocation2]  }
  0x18   :  { %86 = vadd.xlane.f32.xlu0 %v85_v23  ;;  %vm752_vm12 = vcmask 261120   ;;  %s813_s14 = sshll.u32 %s909_s13, 4  ;;  %s814_s14 = int_to_ptr.vmem [resolvable:$true] %s813_s14 }
  0x19   :  { %p887_p1 = scmp.lt.s32.totalorder %s814_s14, %s814_s14 }
  0x1b   :  { %95 = vadd.xlane.f32.xlu1 %v94_v26 }
  0x1c   :  { %92 = vadd.xlane.f32.xlu0 %v91_v27 }
  0x1f   :  { %101 = vadd.xlane.f32.xlu1 %v100_v30 }
  0x20   :  { %98 = vadd.xlane.f32.xlu0 %v97_v31 }
  0x23   :  { %107 = vadd.xlane.f32.xlu1 %v106_v34 }
  0x24   :  { %104 = vadd.xlane.f32.xlu0 %v103_v35 }
  0x27   :  { %113 = vadd.xlane.f32.xlu1 %v112_v38 }
  0x28   :  { %110 = vadd.xlane.f32.xlu0 %v109_v39 }
  0x2b   :  { %119 = vadd.xlane.f32.xlu1 %v118_v42 }
  0x2c   :  { %116 = vadd.xlane.f32.xlu0 %v115_v43 }
  0x2f   :  { %125 = vadd.xlane.f32.xlu1 %v124_v46 }
  0x30   :  { %122 = vadd.xlane.f32.xlu0 %v121_v47 }
  0x33   :  { %131 = vadd.xlane.f32.xlu1 %v130_v50 }
  0x34   :  { %128 = vadd.xlane.f32.xlu0 %v127_v51 }
  0x37   :  { %137 = vadd.xlane.f32.xlu1 %v136_v54 }
  0x38   :  { %134 = vadd.xlane.f32.xlu0 %v133_v55 }
  0x3b   :  { %143 = vadd.xlane.f32.xlu1 %v142_v58 }
  0x3c   :  { %140 = vadd.xlane.f32.xlu0 %v139_v59 }
  0x3f   :  { %149 = vadd.xlane.f32.xlu1 %v148_v62 }
  0x40   :  { %146 = vadd.xlane.f32.xlu0 %v145_v63 }
  0x50   :  { %195 = vbcast.lane.b32.xlu1 %v821_v0, 264 }
  0x54   :  { %199 = vbcast.lane.b32.xlu1 %v821_v0, 272 }
  0x56   :  { %191 = vbcast.lane.b32.xlu0 %v821_v0, 256 }
  0x58   :  { %203 = vbcast.lane.b32.xlu1 %v821_v0, 280 }
  0x5a   :  { %248 = vbcast.lane.b32.xlu0 %v822_v1, 256 }
  0x5c   :  { %252 = vbcast.lane.b32.xlu1 %v822_v1, 264 }
  0x5e   :  { %256 = vbcast.lane.b32.xlu0 %v822_v1, 272 }
  0x60   :  { %260 = vbcast.lane.b32.xlu1 %v822_v1, 280 }
  0x90   :  { %v69_v3 = vpop.xlane.xlu1 %68 }
  0x91   :  { %v57_v4 = vpop.xlane.xlu0 %56  ;;  %v156_v38 = vmul.f32 0.0625, %v69_v3 }
  0x92   :  { %v152_v37 = vmul.f32 0.0625, %v57_v4 }
  0x94   :  { %v72_v5 = vpop.xlane.xlu1 %71 }
  0x95   :  { %v60_v6 = vpop.xlane.xlu0 %59  ;;  %v157_v39 = vmul.f32 0.0625, %v72_v5 }
  0x96   :  { %v153_v40 = vmul.f32 0.0625, %v60_v6 }
  0x98   :  { %v66_v7 = vpop.xlane.xlu1 %65 }
  0x99   :  { %v63_v8 = vpop.xlane.xlu0 %62  ;;  %v155_v41 = vmul.f32 0.0625, %v66_v7 }
  0x9a   :  { %v154_v42 = vmul.f32 0.0625, %v63_v8 }
  0x9c   :  { %v78_v9 = vpop.xlane.xlu1 %77 }
  0x9d   :  { %v75_v10 = vpop.xlane.xlu0 %74  ;;  %v159_v43 = vmul.f32 0.0625, %v78_v9 }
  0x9e   :  { %v158_v45 = vmul.f32 0.0625, %v75_v10 }
  0xa0   :  { %v84_v11 = vpop.xlane.xlu1 %83 }
  0xa1   :  { %v81_v12 = vpop.xlane.xlu0 %80  ;;  %v161_v46 = vmul.f32 0.0625, %v84_v11 }
  0xa2   :  { %v160_v47 = vmul.f32 0.0625, %v81_v12 }
  0xa4   :  { %v90_v13 = vpop.xlane.xlu1 %89 }
  0xa5   :  { %v87_v14 = vpop.xlane.xlu0 %86  ;;  %v163_v51 = vmul.f32 0.0625, %v90_v13 }
  0xa6   :  { %v162_v52 = vmul.f32 0.0625, %v87_v14 }
  0xa8   :  { %v96_v15 = vpop.xlane.xlu1 %95 }
  0xa9   :  { %v93_v16 = vpop.xlane.xlu0 %92  ;;  %v165_v53 = vmul.f32 0.0625, %v96_v15 }
  0xaa   :  { %v164_v55 = vmul.f32 0.0625, %v93_v16 }
  0xac   :  { %v102_v17 = vpop.xlane.xlu1 %101 }
  0xad   :  { %v99_v18 = vpop.xlane.xlu0 %98  ;;  %v1097_v56 = vmul.f32 0.0625, %v102_v17 }
  0xae   :  { %v1099_v57 = vmul.f32 0.0625, %v99_v18 }
  0xb0   :  { %v108_v19 = vpop.xlane.xlu1 %107 }
  0xb1   :  { %v105_v20 = vpop.xlane.xlu0 %104  ;;  %v1102_v59 = vmul.f32 0.0625, %v108_v19 }
  0xb2   :  { %v1104_v60 = vmul.f32 0.0625, %v105_v20 }
  0xb4   :  { %v114_v21 = vpop.xlane.xlu1 %113 }
  0xb5   :  { %v111_v22 = vpop.xlane.xlu0 %110  ;;  %v1106_v61 = vmul.f32 0.0625, %v114_v21 }
  0xb6   :  { %v1108_v62 = vmul.f32 0.0625, %v111_v22 }
  0xb8   :  { %v120_v23 = vpop.xlane.xlu1 %119 }
  0xb9   :  { %v117_v24 = vpop.xlane.xlu0 %116  ;;  %v1110_v63 = vmul.f32 0.0625, %v120_v23 }
  0xba   :  { %v1118_v5 = vmul.f32 0.0625, %v117_v24 }
  0xbc   :  { %v126_v25 = vpop.xlane.xlu1 %125 }
  0xbd   :  { %v123_v26 = vpop.xlane.xlu0 %122  ;;  %v1120_v6 = vmul.f32 0.0625, %v126_v25 }
  0xbe   :  { %v1122_v7 = vmul.f32 0.0625, %v123_v26 }
  0xc0   :  { %v132_v27 = vpop.xlane.xlu1 %131 }
  0xc1   :  { %v129_v28 = vpop.xlane.xlu0 %128  ;;  %v1128_v13 = vmul.f32 0.0625, %v132_v27 }
  0xc2   :  { %v1130_v14 = vmul.f32 0.0625, %v129_v28 }
  0xc4   :  { %v1074_v29 = vpop.xlane.xlu1 %137 }
  0xc5   :  { %v1076_v30 = vpop.xlane.xlu0 %134 }
  0xc8   :  { %v1078_v31 = vpop.xlane.xlu1 %143 }
  0xc9   :  { %v1080_v32 = vpop.xlane.xlu0 %140 }
  0xcc   :  { %v1082_v33 = vpop.xlane.xlu1 %149 }
  0xcd   :  { %v1084_v34 = vpop.xlane.xlu0 %146 }
  0xd0   :  { %v1086_v35 = vpop.permute.xlu1 %195 }
  0xd1   :  { %v1088_v36 = vpop.permute.xlu0 %191  ;;  %v210_v15 = vmul.f32 %v1086_v35, %v153_v40  ;;  %v214_v16 = vmul.f32 %v1086_v35, %v157_v39  ;;  %v218_v20 = vmul.f32 %v1086_v35, %v161_v46  ;;  %v222_v25 = vmul.f32 %v1086_v35, %v165_v53 }
  0xd2   :  { %v209_v44 = vmul.f32 %v1088_v36, %v152_v37  ;;  %v213_v50 = vmul.f32 %v1088_v36, %v156_v38  ;;  %v217_v4 = vmul.f32 %v1088_v36, %v160_v47  ;;  %v221_v24 = vmul.f32 %v1088_v36, %v164_v55 }
  0xd4   :  { %v1091_v48 = vpop.permute.xlu1 %199 }
  0xd5   :  { %v1093_v49 = vpop.permute.xlu0 %248  ;;  %v215_v3 = vmul.f32 %v1091_v48, %v158_v45  ;;  %v211_v8 = vmul.f32 %v1091_v48, %v154_v42  ;;  %v219_v12 = vmul.f32 %v1091_v48, %v162_v52 }
  0xd6   :  { %v266_v54 = vadd.f32 %v1093_v49, %v209_v44  ;;  %v270_v58 = vadd.f32 %v1093_v49, %v213_v50  ;;  %v274_v11 = vadd.f32 %v1093_v49, %v217_v4 }
  0xd8   :  { %v1112_v0 = vpop.permute.xlu1 %203  ;;  %v838_v2 = vround.rtne.f32 %v266_v54  ;;  %v842_v9 = vround.rtne.f32 %v270_v58  ;;  %v846_v37 = vround.rtne.f32 %v274_v11 }
  0xd9   :  { %v1114_v1 = vpop.permute.xlu0 %256  ;;  %v216_v40 = vmul.f32 %v1112_v0, %v159_v43  ;;  %v212_v42 = vmul.f32 %v1112_v0, %v155_v41  ;;  %v220_v47 = vmul.f32 %v1112_v0, %v163_v51 }
  0xda   :  { %v272_v10 = vadd.f32 %v1114_v1, %v215_v3  ;;  %v330_v18 = vmax.f32 %v838_v2, -128.0  ;;  %v268_v19 = vadd.f32 %v1114_v1, %v211_v8  ;;  %v276_v21 = vadd.f32 %v1114_v1, %v219_v12 }
  0xdb   :  { %v334_v26 = vmax.f32 %v842_v9, -128.0 }
  0xdc   :  { %v1134_v17 = vpop.permute.xlu1 %252  ;;  %v844_v27 = vround.rtne.f32 %v272_v10  ;;  %v362_v45 = vmin.f32 %v330_v18, 127.0  ;;  %v840_v46 = vround.rtne.f32 %v268_v19  ;;  %v848_v50 = vround.rtne.f32 %v276_v21 }
  0xdd   :  { %v267_v22 = vadd.f32 %v1134_v17, %v210_v15  ;;  %v271_v23 = vadd.f32 %v1134_v17, %v214_v16  ;;  %v275_v28 = vadd.f32 %v1134_v17, %v218_v20  ;;  %v366_v58 = vmin.f32 %v334_v26, 127.0 }
  0xde   :  { %v336_v2 = vmax.f32 %v844_v27, -128.0  ;;  %v332_v10 = vmax.f32 %v840_v46, -128.0  ;;  %v279_v11 = vadd.f32 %v1134_v17, %v222_v25  ;;  %v340_v12 = vmax.f32 %v848_v50, -128.0 }
  0xdf   :  { %v839_v38 = vround.rtne.f32 %v267_v22  ;;  %v843_v39 = vround.rtne.f32 %v271_v23  ;;  %v847_v3 = vround.rtne.f32 %v275_v28  ;;  %v225_v22 = vmul.f32 %v1088_v36, %v1104_v60 }
  0xe0   :  { %v1146_v44 = vpop.permute.xlu1 %260  ;;  %v226_v23 = vmul.f32 %v1086_v35, %v1102_v59  ;;  %v278_v28 = vadd.f32 %v1093_v49, %v221_v24  ;;  %v223_v25 = vmul.f32 %v1091_v48, %v1099_v57  ;;  %v851_v46 = vround.rtne.f32 %v279_v11 }
  0xe1   :  { %v331_v52 = vmax.f32 %v839_v38, -128.0  ;;  %v335_v53 = vmax.f32 %v843_v39, -128.0  ;;  %v273_v54 = vadd.f32 %v1146_v44, %v216_v40  ;;  %v269_v55 = vadd.f32 %v1146_v44, %v212_v42 }
  0xe2   :  { %v277_v43 = vadd.f32 %v1146_v44, %v220_v47  ;;  %v339_v20 = vmax.f32 %v847_v3, -128.0  ;;  %v364_v39 = vmin.f32 %v332_v10, 127.0  ;;  %v338_v42 = vmax.f32 %v846_v37, -128.0 }
  0xe3   :  { %v363_v4 = vmin.f32 %v331_v52, 127.0  ;;  %v367_v41 = vmin.f32 %v335_v53, 127.0  ;;  %v845_v8 = vround.rtne.f32 %v273_v54  ;;  %v841_v9 = vround.rtne.f32 %v269_v55 }
  0xe4   :  { %v849_v51 = vround.rtne.f32 %v277_v43  ;;  %v372_v47 = vmin.f32 %v340_v12, 127.0  ;;  %v371_v53 = vmin.f32 %v339_v20, 127.0  ;;  %v224_v57 = vmul.f32 %v1112_v0, %v1097_v56 }
  0xe5   :  { %v394_v15 = vpack.c.bf16 %v363_v4, %v362_v45  ;;  %v396_v16 = vpack.c.bf16 %v367_v41, %v366_v58  ;;  %v337_v18 = vmax.f32 %v845_v8, -128.0  ;;  %v333_v19 = vmax.f32 %v841_v9, -128.0 }
  0xe6   :  { %v341_v21 = vmax.f32 %v849_v51, -128.0  ;;  %v368_v45 = vmin.f32 %v336_v2, 127.0  ;;  %v280_v37 = vadd.f32 %v1114_v1, %v223_v25  ;;  %v1170_v55 = vmul.f32 0.0625, %v1074_v29 }
  0xe7   :  { %v438_v26 = vunpack.c.h.b16 %v394_v15  ;;  %v437_v27 = vunpack.c.l.b16 %v394_v15  ;;  %v369_v38 = vmin.f32 %v337_v18, 127.0  ;;  %v365_v40 = vmin.f32 %v333_v19, 127.0 }
  0xe8   :  { %v373_v60 = vmin.f32 %v341_v21, 127.0  ;;  %v441_v50 = vunpack.c.l.b16 %v396_v16  ;;  %v442_v52 = vunpack.c.h.b16 %v396_v16  ;;  %v1173_v58 = vmul.f32 0.0625, %v1076_v30 }
  0xe9   :  { %473 = vperm.xlu1 %875, %v438_v26   ;;  %470 = vperm.xlu0 %874, %v437_v27   ;;  %v1160_v59 = vpack.c.bf16 %v365_v40, %v364_v39  ;;  %v1162_v54 = vpack.c.bf16 %v369_v38, %v368_v45  ;;  %v370_v2 = vmin.f32 %v338_v42, 127.0  ;;  %v282_v3 = vadd.f32 %v1093_v49, %v225_v22 }
  0xea   :  { %v1164_v24 = vpack.c.bf16 %v373_v60, %v372_v47  ;;  %v850_v43 = vround.rtne.f32 %v278_v28  ;;  %v283_v4 = vadd.f32 %v1134_v17, %v226_v23  ;;  %v281_v41 = vadd.f32 %v1146_v44, %v224_v57 }
  0xeb   :  { %v227_v56 = vmul.f32 %v1091_v48, %v1108_v62  ;;  %v398_v8 = vpack.c.bf16 %v371_v53, %v370_v2  ;;  %v343_v9 = vmax.f32 %v851_v46, -128.0  ;;  %v852_v29 = vround.rtne.f32 %v280_v37 }
  0xec   :  { %v228_v30 = vmul.f32 %v1112_v0, %v1106_v61  ;;  %v443_v10 = vunpack.c.l.b16 %v1162_v54  ;;  %v439_v11 = vunpack.c.l.b16 %v1160_v59  ;;  %v853_v51 = vround.rtne.f32 %v281_v41 }
  0xed   :  { %482 = vperm.xlu1 %875, %v441_v50   ;;  %485 = vperm.xlu0 %874, %v442_v52   ;;  %v284_v12 = vadd.f32 %v1114_v1, %v227_v56  ;;  %v854_v15 = vround.rtne.f32 %v282_v3  ;;  %v344_v16 = vmax.f32 %v852_v29, -128.0  ;;  %v229_v18 = vmul.f32 %v1088_v36, %v1118_v5 }
  0xee   :  { %v285_v62 = vadd.f32 %v1146_v44, %v228_v30  ;;  %v342_v19 = vmax.f32 %v850_v43, -128.0  ;;  %v855_v20 = vround.rtne.f32 %v283_v4  ;;  %v345_v21 = vmax.f32 %v853_v51, -128.0 }
  0xef   :  { %v856_v61 = vround.rtne.f32 %v284_v12  ;;  %v446_v22 = vunpack.c.h.b16 %v398_v8  ;;  %v375_v23 = vmin.f32 %v343_v9, 127.0  ;;  %v231_v27 = vmul.f32 %v1091_v48, %v1122_v7 }
  0xf0   :  { %v857_v26 = vround.rtne.f32 %v285_v62  ;;  %v445_v28 = vunpack.c.l.b16 %v398_v8  ;;  %v376_v25 = vmin.f32 %v344_v16, 127.0  ;;  %v377_v38 = vmin.f32 %v345_v21, 127.0 }
  0xf1   :  { %488 = vperm.xlu0 %874, %v443_v10   ;;  %476 = vperm.xlu1 %875, %v439_v11   ;;  %v348_v39 = vmax.f32 %v856_v61, -128.0  ;;  %v230_v5 = vmul.f32 %v1086_v35, %v1110_v63  ;;  %v232_v42 = vmul.f32 %v1112_v0, %v1120_v6  ;;  %v288_v45 = vadd.f32 %v1114_v1, %v231_v27 }
  0xf2   :  { %v349_v40 = vmax.f32 %v857_v26, -128.0  ;;  %v374_v46 = vmin.f32 %v342_v19, 127.0  ;;  %v347_v47 = vmax.f32 %v855_v20, -128.0  ;;  %v1195_v60 = vpack.c.bf16 %v377_v38, %v376_v25 }
  0xf3   :  { %v286_v7 = vadd.f32 %v1093_v49, %v229_v18  ;;  %v287_v50 = vadd.f32 %v1134_v17, %v230_v5  ;;  %v380_v52 = vmin.f32 %v348_v39, 127.0  ;;  %v289_v63 = vadd.f32 %v1146_v44, %v232_v42 }
  0xf4   :  { %v381_v53 = vmin.f32 %v349_v40, 127.0  ;;  %v444_v57 = vunpack.c.h.b16 %v1162_v54  ;;  %v440_v6 = vunpack.c.h.b16 %v1160_v59  ;;  %v400_v37 = vpack.c.bf16 %v375_v23, %v374_v46 }
  0xf5   :  { %497 = vperm.xlu0 %874, %v446_v22   ;;  %494 = vperm.xlu1 %875, %v445_v28   ;;  %v346_v2 = vmax.f32 %v854_v15, -128.0  ;;  %v183_v3 = vmul.f32 0.0625, %v1082_v33  ;;  %v860_v4 = vround.rtne.f32 %v288_v45  ;;  %v861_v41 = vround.rtne.f32 %v289_v63 }
  0xf6   :  { %v1203_v43 = vpack.c.bf16 %v381_v53, %v380_v52  ;;  %v182_v56 = vmul.f32 0.0625, %v1084_v34  ;;  %v379_v8 = vmin.f32 %v347_v47, 127.0  ;;  %v233_v9 = vmul.f32 %v1088_v36, %v1130_v14 }
  0xf7   :  { %v234_v54 = vmul.f32 %v1086_v35, %v1128_v13  ;;  %v859_v59 = vround.rtne.f32 %v287_v50  ;;  %v352_v29 = vmax.f32 %v860_v4, -128.0  ;;  %v353_v30 = vmax.f32 %v861_v41, -128.0 }
  0xf8   :  { %v235_v33 = vmul.f32 %v1091_v48, %v1173_v58  ;;  %v449_v10 = vunpack.c.l.b16 %v400_v37  ;;  %v447_v11 = vunpack.c.l.b16 %v1164_v24  ;;  %v378_v51 = vmin.f32 %v346_v2, 127.0 }
  0xf9   :  { %491 = vperm.xlu0 %874, %v444_v57   ;;  %479 = vperm.xlu1 %875, %v440_v6   ;;  %v858_v34 = vround.rtne.f32 %v286_v7  ;;  %v384_v12 = vmin.f32 %v352_v29, 127.0  ;;  %v385_v15 = vmin.f32 %v353_v30, 127.0  ;;  %v236_v16 = vmul.f32 %v1112_v0, %v1170_v55 }
  0xfa   :  { %v292_v14 = vadd.f32 %v1114_v1, %v235_v33  ;;  %v450_v13 = vunpack.c.h.b16 %v400_v37  ;;  %v402_v18 = vpack.c.bf16 %v379_v8, %v378_v51  ;;  %v239_v62 = vmul.f32 %v1091_v48, %v182_v56 }
  0xfb   :  { %v240_v58 = vmul.f32 %v1112_v0, %v183_v3  ;;  %v351_v19 = vmax.f32 %v859_v59, -128.0  ;;  %v1218_v20 = vpack.c.bf16 %v385_v15, %v384_v12  ;;  %v293_v21 = vadd.f32 %v1146_v44, %v236_v16 }
  0xfc   :  { %v864_v61 = vround.rtne.f32 %v292_v14  ;;  %v448_v22 = vunpack.c.h.b16 %v1164_v24  ;;  %v291_v55 = vadd.f32 %v1134_v17, %v234_v54  ;;  %v296_v23 = vadd.f32 %v1114_v1, %v239_v62 }
  0xfd   :  { %506 = vperm.xlu0 %874, %v449_v10   ;;  %500 = vperm.xlu1 %875, %v447_v11   ;;  %v297_v26 = vadd.f32 %v1146_v44, %v240_v58  ;;  %v180_v27 = vmul.f32 0.0625, %v1080_v32  ;;  %v350_v28 = vmax.f32 %v858_v34, -128.0  ;;  %v865_v48 = vround.rtne.f32 %v293_v21  ;;  %v877_v21 = vld [vmem:[%s1365_s3 + $0x8] sm:$0xff]  }
  0xfe   :  { %v356_v25 = vmax.f32 %v864_v61, -128.0  ;;  %v290_v0 = vadd.f32 %v1093_v49, %v233_v9  ;;  %v868_v38 = vround.rtne.f32 %v296_v23  ;;  %v181_v5 = vmul.f32 0.0625, %v1078_v31 }
  0xff   :  { %v869_v39 = vround.rtne.f32 %v297_v26  ;;  %v453_v24 = vunpack.c.l.b16 %v402_v18  ;;  %v383_v40 = vmin.f32 %v351_v19, 127.0  ;;  %v357_v42 = vmax.f32 %v865_v48, -128.0 }
 0x100   :  { %v451_v1 = vunpack.c.l.b16 %v1195_v60  ;;  %v863_v45 = vround.rtne.f32 %v291_v55  ;;  %v360_v44 = vmax.f32 %v868_v38, -128.0  ;;  %v382_v32 = vmin.f32 %v350_v28, 127.0 }
 0x101   :  { %503 = vperm.xlu0 %874, %v448_v22   ;;  %509 = vperm.xlu1 %875, %v450_v13   ;;  %v361_v46 = vmax.f32 %v869_v39, -128.0  ;;  %v237_v47 = vmul.f32 %v1088_v36, %v180_v27  ;;  %v388_v7 = vmin.f32 %v356_v25, 127.0  ;;  %v389_v50 = vmin.f32 %v357_v42, 127.0 }
 0x102   :  { %v862_v52 = vround.rtne.f32 %v290_v0  ;;  %v238_v53 = vmul.f32 %v1086_v35, %v181_v5  ;;  %v392_v63 = vmin.f32 %v360_v44, 127.0  ;;  %v454_v57 = vunpack.c.h.b16 %v402_v18 }
 0x103   :  { %v393_v31 = vmin.f32 %v361_v46, 127.0  ;;  %v404_v6 = vpack.c.bf16 %v383_v40, %v382_v32  ;;  %v407_v37 = vpack.c.bf16 %v389_v50, %v388_v7  ;;  %v452_v2 = vunpack.c.h.b16 %v1195_v60 }
 0x104   :  { %v355_v3 = vmax.f32 %v863_v45, -128.0  ;;  %v295_v4 = vadd.f32 %v1134_v17, %v238_v53  ;;  %v354_v36 = vmax.f32 %v862_v52, -128.0  ;;  %v294_v56 = vadd.f32 %v1093_v49, %v237_v47 }
 0x105   :  { %518 = vperm.xlu0 %874, %v453_v24   ;;  %512 = vperm.xlu1 %875, %v451_v1   ;;  %v409_v41 = vpack.c.bf16 %v393_v31, %v392_v63  ;;  %v457_v8 = vunpack.c.l.b16 %v404_v6  ;;  %v455_v9 = vunpack.c.l.b16 %v1203_v43  ;;  %v456_v60 = vunpack.c.h.b16 %v1203_v43 }
 0x106   :  { %v387_v35 = vmin.f32 %v355_v3, 127.0  ;;  %v867_v54 = vround.rtne.f32 %v295_v4  ;;  %v386_v59 = vmin.f32 %v354_v36, 127.0  ;;  %v866_v29 = vround.rtne.f32 %v294_v56 }
 0x107   :  { %v458_v30 = vunpack.c.h.b16 %v404_v6  ;;  %v459_v49 = vunpack.c.l.b16 %v1218_v20  ;;  %v460_v12 = vunpack.c.h.b16 %v1218_v20  ;;  %v463_v14 = vunpack.c.l.b16 %v407_v37  ;;  %v876_v20 = vld [vmem:[%s1365_s3] sm:$0xff]  }
 0x108   :  { %v406_v33 = vpack.c.bf16 %v387_v35, %v386_v59  ;;  %v359_v17 = vmax.f32 %v867_v54, -128.0  ;;  %v358_v10 = vmax.f32 %v866_v29, -128.0  ;;  %v464_v13 = vunpack.c.h.b16 %v407_v37 }
 0x109   :  { %515 = vperm.xlu0 %874, %v452_v2   ;;  %521 = vperm.xlu1 %875, %v454_v57   ;;  %v468_v62 = vunpack.c.h.b16 %v409_v41  ;;  %v467_v58 = vunpack.c.l.b16 %v409_v41  ;;  %v907_v19 = vmov 0.0   ;;  %v565_v1 = vlaneseq }
 0x10a   :  { %v461_v11 = vunpack.c.l.b16 %v406_v33  ;;  %v391_v51 = vmin.f32 %v359_v17, 127.0  ;;  %v390_v34 = vmin.f32 %v358_v10, 127.0  ;;  %v462_v15 = vunpack.c.h.b16 %v406_v33  ;;  %830 = vmatprep.subr.bf16.mxu0 %v907_v19  ;;  %834 = vmatprep.mubr.msk.bf16.mxu0 %vm908_vm1, %v907_v19 }
 0x10b   :  { %831 = vmatpush3.bf16.msra.mxu0 %v876_v20  ;;  %v566_v46 = vand.u32 127, %v565_v1  ;;  %v568_v7 = vshrl.u32 %v565_v1, 7 }
 0x10c   :  { %v408_v16 = vpack.c.bf16 %v391_v51, %v390_v34  ;;  %832 = vmatprep.subr.bf16.mxu0 %v907_v19 }
 0x10d   :  { %530 = vperm.xlu0 %874, %v457_v8   ;;  %524 = vperm.xlu1 %875, %v455_v9   ;;  %v571_v50 = vadd.s32 4294967288, %v566_v46  ;;  %v578_v52 = vadd.s32 4294967280, %v566_v46  ;;  %v585_v53 = vadd.s32 4294967272, %v566_v46  ;;  %v1264_v6 = vsub.s32 %v566_v46, %v568_v7 }
 0x10e   :  { %v465_v43 = vunpack.c.l.b16 %v408_v16  ;;  %v466_v18 = vunpack.c.h.b16 %v408_v16 }
 0x10f   :  { %833 = vmatpush3.bf16.msra.mxu0 %v877_v21  ;;  %v1262_v57 = vsub.s32 %v571_v50, %v568_v7  ;;  %v1266_v37 = vsub.s32 %v578_v52, %v568_v7  ;;  %v1268_v2 = vsub.s32 %v585_v53, %v568_v7 }
 0x111   :  { %527 = vperm.xlu0 %874, %v456_v60   ;;  %533 = vperm.xlu1 %875, %v458_v30  }
 0x115   :  { %542 = vperm.xlu0 %874, %v461_v11   ;;  %536 = vperm.xlu1 %875, %v459_v49  }
 0x119   :  { %539 = vperm.xlu0 %874, %v460_v12   ;;  %545 = vperm.xlu1 %875, %v462_v15  }
 0x11d   :  { %554 = vperm.xlu0 %874, %v465_v43   ;;  %548 = vperm.xlu1 %875, %v463_v14  }
 0x121   :  { %551 = vperm.xlu0 %874, %v464_v13   ;;  %557 = vperm.xlu1 %875, %v466_v18  }
 0x125   :  { %563 = vperm.xlu0 %874, %v468_v62   ;;  %560 = vperm.xlu1 %875, %v467_v58  }
 0x168   :  { %v474_v61 = vpop.permute.xlu1 %473  ;;  %v471_v22 = vpop.permute.xlu0 %470 }
 0x169   :  { %v575_v41 = vrot.slane %v474_v61, %v1262_v57  ;;  %v570_v36 = vrot.slane %v471_v22, %v1264_v6 }
 0x16b   :  { %v577_v10 = vsel %vm576_vm2, %v575_v41, %v570_v36 }
 0x16c   :  { %v483_v55 = vpop.permute.xlu1 %482  ;;  %v486_v23 = vpop.permute.xlu0 %485 }
 0x16d   :  { %v595_v56 = vrot.slane %v483_v55, %v1264_v6  ;;  %v599_v8 = vrot.slane %v486_v23, %v1262_v57 }
 0x16f   :  { %v600_v11 = vsel %vm576_vm2, %v599_v8, %v595_v56 }
 0x170   :  { %v477_v26 = vpop.permute.xlu1 %476  ;;  %v489_v27 = vpop.permute.xlu0 %488 }
 0x171   :  { %v582_v9 = vrot.slane %v477_v26, %v1266_v37  ;;  %v604_v35 = vrot.slane %v489_v27, %v1266_v37 }
 0x173   :  { %v584_v51 = vsel %vm583_vm3, %v582_v9, %v577_v10  ;;  %v605_v34 = vsel %vm583_vm3, %v604_v35, %v600_v11 }
 0x174   :  { %v495_v28 = vpop.permute.xlu1 %494  ;;  %v498_v48 = vpop.permute.xlu0 %497 }
 0x175   :  { %v614_v54 = vrot.slane %v495_v28, %v1264_v6  ;;  %v618_v59 = vrot.slane %v498_v48, %v1262_v57 }
 0x177   :  { %v619_v12 = vsel %vm576_vm2, %v618_v59, %v614_v54 }
 0x178   :  { %v480_v25 = vpop.permute.xlu1 %479  ;;  %v492_v0 = vpop.permute.xlu0 %491 }
 0x179   :  { %v589_v29 = vrot.slane %v480_v25, %v1268_v2  ;;  %v609_v33 = vrot.slane %v492_v0, %v1268_v2 }
 0x17b   :  { %v591_v15 = vsel %vm590_vm4, %v589_v29, %v584_v51  ;;  %v610_v18 = vsel %vm590_vm4, %v609_v33, %v605_v34 }
 0x17c   :  { %v501_v38 = vpop.permute.xlu1 %500  ;;  %v507_v39 = vpop.permute.xlu0 %506 }
 0x17d   :  { %v623_v17 = vrot.slane %v501_v38, %v1266_v37  ;;  %v633_v16 = vrot.slane %v507_v39, %v1264_v6 }
 0x17f   :  { %v624_v62 = vsel %vm583_vm3, %v623_v17, %v619_v12 }
 0x180   :  { %v510_v5 = vpop.permute.xlu1 %509  ;;  %v1244_v24 = vpop.permute.xlu0 %503 }
 0x181   :  { %v637_v49 = vrot.slane %v510_v5, %v1262_v57  ;;  %v628_v43 = vrot.slane %v1244_v24, %v1268_v2 }
 0x183   :  { %v638_v20 = vsel %vm576_vm2, %v637_v49, %v633_v16  ;;  %v629_v28 = vsel %vm590_vm4, %v628_v43, %v624_v62 }
 0x184   :  { %v1246_v40 = vpop.permute.xlu1 %512  ;;  %v1248_v42 = vpop.permute.xlu0 %518 }
 0x185   :  { %v642_v58 = vrot.slane %v1246_v40, %v1266_v37  ;;  %v652_v55 = vrot.slane %v1248_v42, %v1264_v6 }
 0x187   :  { %v643_v5 = vsel %vm583_vm3, %v642_v58, %v638_v20 }
 0x188   :  { %v1250_v45 = vpop.permute.xlu1 %521  ;;  %v1252_v44 = vpop.permute.xlu0 %515 }
 0x189   :  { %v656_v19 = vrot.slane %v1250_v45, %v1262_v57  ;;  %v647_v21 = vrot.slane %v1252_v44, %v1268_v2 }
 0x18b   :  { %v657_v24 = vsel %vm576_vm2, %v656_v19, %v652_v55  ;;  %v648_v1 = vsel %vm590_vm4, %v647_v21, %v643_v5 }
 0x18c   :  { %v1254_v32 = vpop.permute.xlu1 %524  ;;  %v1256_v47 = vpop.permute.xlu0 %530 }
 0x18d   :  { %v661_v61 = vrot.slane %v1254_v32, %v1266_v37  ;;  %v671_v48 = vrot.slane %v1256_v47, %v1264_v6  ;;  %v726_v32 = vsel %vm725_vm5, %v610_v18, %v591_v15 }
 0x18e   :  { %v728_v52 = vsel %vm727_vm6, %v629_v28, %v726_v32 }
 0x18f   :  { %v662_v45 = vsel %vm583_vm3, %v661_v61, %v657_v24 }
 0x190   :  { %v1258_v63 = vpop.permute.xlu1 %533  ;;  %v1260_v31 = vpop.permute.xlu0 %527 }
 0x191   :  { %v675_v22 = vrot.slane %v1258_v63, %v1262_v57  ;;  %v666_v23 = vrot.slane %v1260_v31, %v1268_v2 }
 0x193   :  { %v676_v44 = vsel %vm576_vm2, %v675_v22, %v671_v48  ;;  %v667_v47 = vsel %vm590_vm4, %v666_v23, %v662_v45 }
 0x194   :  { %v1270_v3 = vpop.permute.xlu1 %536  ;;  %v1272_v4 = vpop.permute.xlu0 %542 }
 0x195   :  { %v680_v26 = vrot.slane %v1270_v3, %v1266_v37  ;;  %v690_v40 = vrot.slane %v1272_v4, %v1264_v6 }
 0x197   :  { %v681_v7 = vsel %vm583_vm3, %v680_v26, %v676_v44 }
 0x198   :  { %v546_v60 = vpop.permute.xlu1 %545  ;;  %v540_v30 = vpop.permute.xlu0 %539 }
 0x199   :  { %v694_v27 = vrot.slane %v546_v60, %v1262_v57  ;;  %v685_v25 = vrot.slane %v540_v30, %v1268_v2 }
 0x19b   :  { %v695_v50 = vsel %vm576_vm2, %v694_v27, %v690_v40  ;;  %v686_v53 = vsel %vm590_vm4, %v685_v25, %v681_v7 }
 0x19c   :  { %v549_v14 = vpop.permute.xlu1 %548  ;;  %v555_v13 = vpop.permute.xlu0 %554 }
 0x19d   :  { %v699_v0 = vrot.slane %v549_v14, %v1266_v37  ;;  %v709_v31 = vrot.slane %v555_v13, %v1264_v6 }
 0x19f   :  { %v700_v63 = vsel %vm583_vm3, %v699_v0, %v695_v50 }
 0x1a0   :  { %v558_v38 = vpop.permute.xlu1 %557  ;;  %v552_v39 = vpop.permute.xlu0 %551 }
 0x1a1   :  { %v704_v42 = vrot.slane %v552_v39, %v1268_v2  ;;  %v713_v46 = vrot.slane %v558_v38, %v1262_v57  ;;  %v730_v57 = vsel %vm729_vm7, %v648_v1, %v728_v52 }
 0x1a2   :  { %v732_v8 = vsel %vm731_vm8, %v667_v47, %v730_v57 }
 0x1a3   :  { %v705_v41 = vsel %vm590_vm4, %v704_v42, %v700_v63  ;;  %v714_v9 = vsel %vm576_vm2, %v713_v46, %v709_v31  ;;  %v734_v35 = vsel %vm733_vm9, %v686_v53, %v732_v8 }
 0x1a4   :  { %v561_v3 = vpop.permute.xlu1 %560  ;;  %v564_v4 = vpop.permute.xlu0 %563  ;;  %v736_v6 = vsel %vm735_vm10, %v705_v41, %v734_v35 }
 0x1a5   :  { %v718_v36 = vrot.slane %v561_v3, %v1266_v37  ;;  %v723_v56 = vrot.slane %v564_v4, %v1268_v2  ;;  %v823_v37 = vld [vmem:[%s1366_s4] ss:$0 sm:$0xff]  ;;  %s882_s4 = scalar_lea.vmem %s814_s14, 128 }
 0x1a6   :  { %p883_p0 = scmp.ne.s32.totalorder %s814_s14, %s882_s4  ;;  %p888_p2 = scmp.lt.s32.totalorder %s882_s4, %s882_s4 }
 0x1a7   :  { %v719_v54 = vsel %vm583_vm3, %v718_v36, %v714_v9 }
 0x1a8   :  { %v724_v59 = vsel %vm590_vm4, %v723_v56, %v719_v54  ;;  %p889_p3 = por %p888_p2, %p887_p1 }
 0x1a9   :  { %v738_v29 = vsel %vm737_vm11, %v724_v59, %v736_v6 }
 0x1aa   :  { %v739_v60 = vpack.c.b16 %v738_v29, %v738_v29  ;;  %p890_p4 = pnand %p889_p3, %p883_p0 }
 0x1ac   :  { %835 = vmatmul.mubr.msk.bf16.vlgmr.msra.gmra.mrb[0].mxu0 %vm752_vm12, %v739_v60 }
 0x27f   :  { %v790_v2 = vpop.f32.mrb[0].mxu0 }
 0x280   :  { %v791_v30 = vadd.f32 %v823_v37, %v790_v2  ;;  %v836_v33 = vpop.f32.mrb[1].mxu0 }
 0x281   :  { %v793_v17 = vpop.f32.mrb[2].mxu0 }
 0x282   :  { %796 = vmax.xlane.f32.xlu1 %v791_v30  ;;  %v837_v10 = vpop.f32.mrb[3].mxu0 }
 0x30f   :  { %v797_v11 = vpop.xlane.xlu1 %796 }
 0x310   :  { %v798_v49 = vsub.f32 %v791_v30, %v797_v11 }
 0x312   :  { %v799_v51 = vmul.f32 1.442695, %v798_v49 }
 0x314   :  { %878 = vpow2.f32 %v799_v51 }
 0x31e   :  { %v879_v34 = vpop.eup %878 }
 0x31f   :  { %801 = vadd.xlane.f32.xlu0 %v879_v34 }
 0x3ac   :  { %v802_v12 = vpop.xlane.xlu0 %801 }
 0x3ad   :  { %880 = vlog2.f32 %v802_v12 }
 0x3b7   :  { %v881_v15 = vpop.eup %880 }
 0x3b8   :  { %v804_v16 = vmul.f32 0.6931472, %v881_v15 }
 0x3ba   :  { %v805_v43 = vsub.f32 %v798_v49, %v804_v16 }
 0x3bc   :  { %806 = vst [vmem:[#allocation2] sm:$0xff] %v805_v43 }
 0x3bd   :  { %893 = shalt.err (!%p890_p4)
}
 0x3be   :  { %s894_s17 = scalar_lea.hbm %s1367_s5, 128 }
 0x3bf   :  { %p895_p5 = scmp.ne.s32.totalorder %s1367_s5, %s894_s17  ;;  %p898_p6 = scmp.lt.u32.totalorder %s894_s17, %s1367_s5 }
 0x3c1   :  { %p900_p7 = pnand %p898_p6, %p895_p5 }
 0x3c3   :  { %903 = shalt.err (!%p900_p7)
}
 0x3c4   :  { %816 = dma.vmem_to_hbm [thread:$0]  %s814_s14, 128, %s1367_s5, [#allocation3]  }
 0x3c5   :  { %904 = dma.done.wait [#allocation3], 128  }
 0x3c6   :  { %905 = vsyncadd [#allocation3], 4294967168 }
 0x3c7   :  { %820 = vsyncpa [#allocation3], 1 }

</bundles_post_ra>
